<compile_context>
chip_gen: v6e
topology: v6e:2x2x1
jax: 0.10.0
libtpu: 0.0.40
codegen_flags: <defaults>
</compile_context>

<pallas_src>
import math

import numpy as np

import jax
import jax.numpy as jnp
from jax import lax
from jax.experimental import pallas as pl
from jax.experimental.pallas import tpu as pltpu

_MB = 1024 * 1024


def _compiler_params(parallel_dims, est_bytes):
    limit = None
    if 2 * est_bytes > 12 * _MB:
        limit = int(min(48 * _MB, 2 * est_bytes + 8 * _MB))
    return pltpu.CompilerParams(dimension_semantics=parallel_dims,
                                vmem_limit_bytes=limit)


def _pick_tm(mg, bytes_per_row, budget_bytes=16 * _MB):
    # double-buffered tile rows under a VMEM budget; multiple of 8 or full.
    tm = budget_bytes // max(1, 2 * bytes_per_row)
    tm = int(min(tm, 4096, mg))
    if tm >= mg:
        return mg
    return max(8, (tm // 8) * 8)


# ----------------------------------------------------------------------------
# Stage 1 (fused): 1x1 conv (no bias) + folded BatchNorm + attention fusion.
# Grouped layout: each row holds G consecutive pixels (pixel-major,
# channel-minor), so the output tile is [tm, G*Cmid] with G*Cmid % 128 == 0.
# NOTE: a ragged final block reads padded garbage rows; results are masked on
# store, but garbage lanes may carry NaN/Inf (harmless here).
# ----------------------------------------------------------------------------
def _stage1_fuse_kernel(x_ref, y_ref, wbd_ref, wxg_ref, wyg_ref, bg_ref,
                        e_ref, scale_ref, shift_ref, o_ref):
    g = e_ref.shape[0]
    x = x_ref[...].astype(jnp.float32)                       # (tm, G*Cin)
    y = y_ref[...].astype(jnp.float32)                       # (tm, G*Cmid)
    # per-pixel 1x1 conv via block-diagonal weight, then folded BN
    h = jnp.dot(x, wbd_ref[...], preferred_element_type=jnp.float32)
    h = h * scale_ref[...] + shift_ref[...]                  # (tm, G*Cmid)
    # attention logits: two gates per pixel -> (tm, 2G)
    logits = (jnp.dot(h, wxg_ref[...], preferred_element_type=jnp.float32)
              + jnp.dot(y, wyg_ref[...], preferred_element_type=jnp.float32)
              + bg_ref[...])
    z = jax.nn.sigmoid(logits)
    # expand each pixel's gate across that pixel's Cmid lanes
    z0 = jnp.dot(z[:, :g], e_ref[...], preferred_element_type=jnp.float32)
    z1 = jnp.dot(z[:, g:], e_ref[...], preferred_element_type=jnp.float32)
    o_ref[...] = (h * z0 + y * z1).astype(o_ref.dtype)


def _stage1_nofuse_kernel(x_ref, wbd_ref, scale_ref, shift_ref, o_ref):
    h = jnp.dot(x_ref[...].astype(jnp.float32), wbd_ref[...],
                preferred_element_type=jnp.float32)
    o_ref[...] = (h * scale_ref[...] + shift_ref[...]).astype(o_ref.dtype)


def stage1_fuse(x_g, y_g, wbd, wxg, wyg, bg, e, scale_g, shift_g):
    mg, kin = x_g.shape
    kout = wbd.shape[1]
    two_g = bg.shape[1]
    g = e.shape[0]
    bytes_per_row = 4 * (kin + 2 * kout)          # x row + y row + out row
    tm = _pick_tm(mg, bytes_per_row)
    w_bytes = 4 * (wbd.size + wxg.size + wyg.size + bg.size + e.size
                   + scale_g.size + shift_g.size)
    est = 2 * tm * bytes_per_row + w_bytes
    return pl.pallas_call(
        _stage1_fuse_kernel,
        out_shape=jax.ShapeDtypeStruct((mg, kout), x_g.dtype),
        grid_spec=pltpu.PrefetchScalarGridSpec(
            num_scalar_prefetch=0,
            grid=(pl.cdiv(mg, tm),),
            in_specs=[
                pl.BlockSpec((tm, kin), lambda i: (i, 0)),
                pl.BlockSpec((tm, kout), lambda i: (i, 0)),
                pl.BlockSpec((kin, kout), lambda i: (0, 0)),
                pl.BlockSpec((kout, two_g), lambda i: (0, 0)),
                pl.BlockSpec((kout, two_g), lambda i: (0, 0)),
                pl.BlockSpec((1, two_g), lambda i: (0, 0)),
                pl.BlockSpec((g, kout), lambda i: (0, 0)),
                pl.BlockSpec((1, kout), lambda i: (0, 0)),
                pl.BlockSpec((1, kout), lambda i: (0, 0)),
            ],
            out_specs=pl.BlockSpec((tm, kout), lambda i: (i, 0)),
        ),
        compiler_params=_compiler_params(("parallel",), est),
    )(x_g, y_g, wbd, wxg, wyg, bg, e, scale_g, shift_g)


def stage1_nofuse(x_g, wbd, scale_g, shift_g):
    mg, kin = x_g.shape
    kout = wbd.shape[1]
    bytes_per_row = 4 * (kin + kout)
    tm = _pick_tm(mg, bytes_per_row)
    est = 2 * tm * bytes_per_row + 4 * (wbd.size + scale_g.size + shift_g.size)
    return pl.pallas_call(
        _stage1_nofuse_kernel,
        out_shape=jax.ShapeDtypeStruct((mg, kout), x_g.dtype),
        grid_spec=pltpu.PrefetchScalarGridSpec(
            num_scalar_prefetch=0,
            grid=(pl.cdiv(mg, tm),),
            in_specs=[
                pl.BlockSpec((tm, kin), lambda i: (i, 0)),
                pl.BlockSpec((kin, kout), lambda i: (0, 0)),
                pl.BlockSpec((1, kout), lambda i: (0, 0)),
                pl.BlockSpec((1, kout), lambda i: (0, 0)),
            ],
            out_specs=pl.BlockSpec((tm, kout), lambda i: (i, 0)),
        ),
        compiler_params=_compiler_params(("parallel",), est),
    )(x_g, wbd, scale_g, shift_g)


# ----------------------------------------------------------------------------
# Stage 2: 3x3 conv (pad=1, stride=1, no bias) + folded BatchNorm.
# One image (NHWC) per grid step.  Padding is done in-kernel into a VMEM
# scratch (no HBM pad pass); the conv is a 9-tap shifted-window matmul
# accumulation (no 9x im2col slab); the output is stored lane-dense as a
# (P/g2, g2*Cout) slab and reshaped back to NHWC in the wrapper.
# ----------------------------------------------------------------------------
def _make_conv3x3_kernel(hh, ww, cin, cout, g2):
    p = hh * ww

    def kernel(x_ref, w_ref, scale_ref, shift_ref, o_ref, xp_scr):
        # zero-pad into VMEM scratch
        xp_scr[...] = jnp.zeros(xp_scr.shape, jnp.float32)
        xp_scr[1:hh + 1, 1:ww + 1, :] = x_ref[0].astype(jnp.float32)
        acc = None
        for ky in range(3):
            for kx in range(3):
                win = xp_scr[ky:ky + hh, kx:kx + ww, :].reshape(p, cin)
                part = jnp.dot(win, w_ref[ky * 3 + kx],
                               preferred_element_type=jnp.float32)
                acc = part if acc is None else acc + part
        out = acc * scale_ref[...] + shift_ref[...]           # (P, Cout)
        o_ref[0] = out.reshape(p // g2, g2 * cout).astype(o_ref.dtype)

    return kernel


def _pick_out_group(cout, p):
    if cout % 128 == 0:
        return 1
    g2 = math.lcm(cout, 128) // cout
    if p % g2 == 0 and g2 * cout <= 1024:
        return g2
    return 1


def conv3x3_bn(x_nhwc, w_taps, scale, shift):
    n, hh, ww, cin = x_nhwc.shape
    cout = w_taps.shape[-1]
    p = hh * ww
    g2 = _pick_out_group(cout, p)
    kernel = _make_conv3x3_kernel(hh, ww, cin, cout, g2)
    est = 4 * (2 * (p * cin + p * cout)                 # dbl-buffered in/out
               + (hh + 2) * (ww + 2) * cin              # pad scratch
               + p * cin + 2 * p * cout                 # window + acc temps
               + w_taps.size + scale.size + shift.size)
    out2d = pl.pallas_call(
        kernel,
        out_shape=jax.ShapeDtypeStruct((n, p // g2, g2 * cout), x_nhwc.dtype),
        grid_spec=pltpu.PrefetchScalarGridSpec(
            num_scalar_prefetch=0,
            grid=(n,),
            in_specs=[
                pl.BlockSpec((1, hh, ww, cin), lambda i: (i, 0, 0, 0)),
                pl.BlockSpec((9, cin, cout), lambda i: (0, 0, 0)),
                pl.BlockSpec((1, cout), lambda i: (0, 0)),
                pl.BlockSpec((1, cout), lambda i: (0, 0)),
            ],
            out_specs=pl.BlockSpec((1, p // g2, g2 * cout),
                                   lambda i: (i, 0, 0)),
            scratch_shapes=[pltpu.VMEM((hh + 2, ww + 2, cin), jnp.float32)],
        ),
        compiler_params=_compiler_params(("parallel",), est),
    )(x_nhwc, w_taps, scale, shift)
    return out2d.reshape(n, hh, ww, cout)


# ----------------------------------------------------------------------------
# Glue: nearest-neighbor index selection (PyTorch 'nearest': src = dst*in//out)
# Static (numpy) indices -> identity / strided slice / repeat when possible,
# so integer ratios never produce gathers.
# ----------------------------------------------------------------------------
def _nearest_src_idx(out_size, in_size):
    return np.arange(out_size) * in_size // out_size


def _take_idx_axis(x, idx, axis):
    idx = np.asarray(idx)
    n = x.shape[axis]
    if idx.size == n and np.array_equal(idx, np.arange(n)):
        return x
    if idx.size == 1:
        sl = [slice(None)] * x.ndim
        sl[axis] = slice(int(idx[0]), int(idx[0]) + 1)
        return x[tuple(sl)]
    d = np.diff(idx)
    if np.all(d == d[0]) and d[0] >= 1:                 # strided selection
        step = int(d[0])
        sl = [slice(None)] * x.ndim
        sl[axis] = slice(int(idx[0]), int(idx[0]) + step * idx.size, step)
        return x[tuple(sl)]
    if idx.size % n == 0 and np.array_equal(
            idx, np.repeat(np.arange(n), idx.size // n)):  # integer upscale
        return jnp.repeat(x, idx.size // n, axis=axis)
    return jnp.take(x, jnp.asarray(idx, jnp.int32), axis=axis)


def nearest_resize(x, oh, ow, h_axis, w_axis):
    x = _take_idx_axis(x, _nearest_src_idx(oh, x.shape[h_axis]), h_axis)
    x = _take_idx_axis(x, _nearest_src_idx(ow, x.shape[w_axis]), w_axis)
    return x


# ----------------------------------------------------------------------------
# Parameter setup (deterministic, mimics the PyTorch __init__)
# ----------------------------------------------------------------------------
def _kaiming_uniform(key, shape, a=1.0):
    fan_in = shape[1] * shape[2] * shape[3]
    gain = math.sqrt(2.0 / (1.0 + a * a))
    bound = gain * math.sqrt(3.0 / fan_in)
    return jax.random.uniform(key, shape, jnp.float32, -bound, bound)


def make_abf_params(key, in_channel, mid_channel, out_channel, fuse):
    k1, k2, k3, k4 = jax.random.split(key, 4)
    eps = 1e-5

    conv1_w = _kaiming_uniform(k1, (mid_channel, in_channel, 1, 1))
    conv2_w = _kaiming_uniform(k2, (out_channel, mid_channel, 3, 3))

    def bn_params(c, base):
        gamma = 1.0 + 0.1 * jnp.arange(c, dtype=jnp.float32) / c
        beta = base + 0.05 * jnp.arange(c, dtype=jnp.float32) / c
        mean = 0.02 * jnp.arange(c, dtype=jnp.float32) / c
        var = 1.0 + 0.03 * jnp.arange(c, dtype=jnp.float32) / c
        return gamma, beta, mean, var

    bn1 = bn_params(mid_channel, 0.01)
    bn2 = bn_params(out_channel, -0.01)

    raw = dict(conv1_w=conv1_w, conv2_w=conv2_w,
               bn1_gamma=bn1[0], bn1_beta=bn1[1], bn1_mean=bn1[2], bn1_var=bn1[3],
               bn2_gamma=bn2[0], bn2_beta=bn2[1], bn2_mean=bn2[2], bn2_var=bn2[3],
               att_w=None, att_b=None, eps=eps)

    if fuse:
        bnd = 1.0 / math.sqrt(2 * mid_channel)
        raw['att_w'] = jax.random.uniform(k3, (2, 2 * mid_channel, 1, 1),
                                          jnp.float32, -bnd, bnd)
        raw['att_b'] = jax.random.uniform(k4, (2,), jnp.float32, -bnd, bnd)

    def fold_bn(gamma, beta, mean, var):
        s = gamma / jnp.sqrt(var + eps)
        return s, beta - mean * s

    s1, sh1 = fold_bn(*bn1)
    s2, sh2 = fold_bn(*bn2)

    params = {
        'w1': conv1_w.reshape(mid_channel, in_channel).T,        # (Cin, Cmid)
        'bn1_scale': s1,                                         # (Cmid,)
        'bn1_shift': sh1,                                        # (Cmid,)
        'w2_taps': jnp.transpose(conv2_w, (2, 3, 1, 0)).reshape(
            9, mid_channel, out_channel),                        # (9, Cmid, Cout)
        'bn2_scale': s2.reshape(1, -1),
        'bn2_shift': sh2.reshape(1, -1),
        'att_wx': None, 'att_wy': None, 'att_b': None,
    }
    if fuse:
        wa = raw['att_w'].reshape(2, 2 * mid_channel)
        params['att_wx'] = wa[:, :mid_channel].T                 # (Cmid, 2)
        params['att_wy'] = wa[:, mid_channel:].T                 # (Cmid, 2)
        params['att_b'] = raw['att_b']                           # (2,)
    return params, raw


def _block_diag(w, g):
    a, b = w.shape
    eye = jnp.eye(g, dtype=w.dtype)
    return (eye[:, None, :, None] * w[None, :, None, :]).reshape(g * a, g * b)


def _pick_group(cmid, cin, m):
    if cmid % 128 == 0:
        return 1
    g = math.lcm(cmid, 128) // cmid
    if m % g == 0 and g * cmid <= 1024 and g * cin <= 4096:
        return g
    return 1


def _group_stage1_params(params, g):
    cmid = params['w1'].shape[1]
    gp = {
        'wbd': _block_diag(params['w1'], g),                     # (G*Cin, G*Cmid)
        'scale_g': jnp.tile(params['bn1_scale'].reshape(1, -1), (1, g)),
        'shift_g': jnp.tile(params['bn1_shift'].reshape(1, -1), (1, g)),
        'wxg': None, 'wyg': None, 'bg': None, 'e': None,
    }
    if params['att_wx'] is not None:
        wx, wy, b = params['att_wx'], params['att_wy'], params['att_b']
        gp['wxg'] = jnp.concatenate(
            [_block_diag(wx[:, 0:1], g), _block_diag(wx[:, 1:2], g)], axis=1)
        gp['wyg'] = jnp.concatenate(
            [_block_diag(wy[:, 0:1], g), _block_diag(wy[:, 1:2], g)], axis=1)
        gp['bg'] = jnp.concatenate(
            [jnp.full((1, g), b[0], jnp.float32),
             jnp.full((1, g), b[1], jnp.float32)], axis=1)       # (1, 2G)
        gp['e'] = _block_diag(jnp.ones((1, cmid), jnp.float32), g)  # (G, G*Cmid)
    return gp


# ----------------------------------------------------------------------------
# ABF forward (Pallas path).  Inputs/outputs are NCHW like PyTorch.
# ----------------------------------------------------------------------------
def abf_forward(params, x_nchw, y_nchw=None, shape=None, out_shape=None):
    n, cin, h, w = x_nchw.shape
    cmid = params['w1'].shape[1]
    fuse = params['att_wx'] is not None
    if out_shape is None:
        out_shape = w

    # Commute the trailing nearest-downsample through the strictly per-pixel
    # stage 1.  Exact ONLY for 'nearest' interpolation + per-pixel stage 1;
    # do not reuse for bilinear modes.
    commute = out_shape < h
    if commute:
        sh = sw = out_shape
        idx_h = _nearest_src_idx(out_shape, h)
        idx_w = _nearest_src_idx(out_shape, w)
        x_sel = _take_idx_axis(_take_idx_axis(x_nchw, idx_h, 2), idx_w, 3)
    else:
        sh, sw = h, w
        x_sel = x_nchw

    m = n * sh * sw
    g = _pick_group(cmid, cin, m)
    gp = _group_stage1_params(params, g)

    # TODO(synk): fuse the NCHW->NHWC transpose into the stage-1 BlockSpec
    # (channels-last end-to-end) to remove this glue HBM pass.
    x_rows = jnp.transpose(x_sel, (0, 2, 3, 1)).reshape(m // g, g * cin)

    if fuse:
        assert y_nchw is not None and shape is not None
        y_nhwc = jnp.transpose(y_nchw, (0, 2, 3, 1))
        yh, yw = y_nhwc.shape[1], y_nhwc.shape[2]
        if commute and shape == h:
            # compose (y -> (shape,shape) nearest) with the final downsample;
            # for integer ratios this collapses to identity / strided slicing.
            yi_h = _nearest_src_idx(shape, yh)[_nearest_src_idx(out_shape, h)]
            yi_w = _nearest_src_idx(shape, yw)[_nearest_src_idx(out_shape, w)]
            y_sel = _take_idx_axis(_take_idx_axis(y_nhwc, yi_h, 1), yi_w, 2)
        elif commute:
            y_sel = nearest_resize(y_nhwc, shape, shape, 1, 2)
            y_sel = _take_idx_axis(
                _take_idx_axis(y_sel, _nearest_src_idx(out_shape, h), 1),
                _nearest_src_idx(out_shape, w), 2)
        else:
            y_sel = nearest_resize(y_nhwc, shape, shape, 1, 2)
        y_rows = y_sel.reshape(m // g, g * cmid)
        x1_rows = stage1_fuse(x_rows, y_rows, gp['wbd'], gp['wxg'], gp['wyg'],
                              gp['bg'], gp['e'], gp['scale_g'], gp['shift_g'])
    else:
        x1_rows = stage1_nofuse(x_rows, gp['wbd'], gp['scale_g'], gp['shift_g'])

    x1 = x1_rows.reshape(n, sh, sw, cmid)
    if not commute and sh != out_shape:
        # upsample path: per-pixel stage 1 at native resolution, then repeat
        x1 = nearest_resize(x1, out_shape, out_shape, 1, 2)

    y_out = conv3x3_bn(x1, params['w2_taps'],
                       params['bn2_scale'], params['bn2_shift'])

    return (jnp.transpose(y_out, (0, 3, 1, 2)),
            jnp.transpose(x1, (0, 3, 1, 2)))


# ----------------------------------------------------------------------------
# Pure-JAX reference (NCHW, lax.conv) for correctness check
# ----------------------------------------------------------------------------
def _ref_conv(x, w, padding):
    return lax.conv_general_dilated(x, w, (1, 1), padding,
                                    dimension_numbers=('NCHW', 'OIHW', 'NCHW'))


def _ref_bn(x, gamma, beta, mean, var, eps):
    s = (gamma / jnp.sqrt(var + eps)).reshape(1, -1, 1, 1)
    b = (beta - mean * gamma / jnp.sqrt(var + eps)).reshape(1, -1, 1, 1)
    return x * s + b


def _ref_nearest_nchw(x, oh, ow):
    h, w = x.shape[2], x.shape[3]
    ih = (jnp.arange(oh) * h // oh).astype(jnp.int32)
    iw = (jnp.arange(ow) * w // ow).astype(jnp.int32)
    return x[:, :, ih][:, :, :, iw]


def ref_forward(raw, x, y=None, shape=None, out_shape=None):
    eps = raw['eps']
    x1 = _ref_bn(_ref_conv(x, raw['conv1_w'], 'VALID'),
                 raw['bn1_gamma'], raw['bn1_beta'], raw['bn1_mean'],
                 raw['bn1_var'], eps)
    if raw['att_w'] is not None:
        y2 = _ref_nearest_nchw(y, shape, shape)
        z = _ref_conv(jnp.concatenate([x1, y2], axis=1), raw['att_w'], 'VALID')
        z = jax.nn.sigmoid(z + raw['att_b'].reshape(1, 2, 1, 1))
        x1 = x1 * z[:, 0:1] + y2 * z[:, 1:2]
    if x1.shape[-1] != out_shape:
        x1 = _ref_nearest_nchw(x1, out_shape, out_shape)
    y_out = _ref_bn(_ref_conv(x1, raw['conv2_w'], ((1, 1), (1, 1))),
                    raw['bn2_gamma'], raw['bn2_beta'], raw['bn2_mean'],
                    raw['bn2_var'], eps)
    return y_out, x1


# ----------------------------------------------------------------------------
if __name__ == "__main__":
    key = jax.random.PRNGKey(0)
    kx, ky, kp, kx2, kp2 = jax.random.split(key, 5)

    # --- Test 1: fused path with y-upsample + x1-downsample (commuted) -------
    in_channel, mid_channel, out_channel = 4, 8, 8
    N, H, W = 2, 16, 16
    shape, out_shape = 16, 8          # y 8->16 then fused x1 16->8

    x = jax.random.normal(kx, (N, in_channel, H, W), jnp.float32)     # NCHW
    y = jax.random.normal(ky, (N, mid_channel, 8, 8), jnp.float32)    # NCHW

    params, raw = make_abf_params(kp, in_channel, mid_channel, out_channel, True)

    out_y, out_x = abf_forward(params, x, y, shape=shape, out_shape=out_shape)
    out_y = jax.block_until_ready(out_y)
    out_x = jax.block_until_ready(out_x)

    ref_y, ref_x = ref_forward(raw, x, y, shape=shape, out_shape=out_shape)

    assert out_y.shape == (N, out_channel, out_shape, out_shape), out_y.shape
    assert out_x.shape == (N, mid_channel, out_shape, out_shape), out_x.shape
    assert jnp.allclose(out_y, ref_y, atol=1e-4, rtol=1e-4), "conv2 output mismatch"
    assert jnp.allclose(out_x, ref_x, atol=1e-4, rtol=1e-4), "fused feature mismatch"

    # --- Test 2: no-fuse path, no resize -------------------------------------
    in2, mid2, out2 = 8, 16, 16
    x2 = jax.random.normal(kx2, (N, in2, H, W), jnp.float32)
    params2, raw2 = make_abf_params(kp2, in2, mid2, out2, False)

    out_y2, out_x2 = abf_forward(params2, x2, None, shape=None, out_shape=W)
    out_y2 = jax.block_until_ready(out_y2)
    out_x2 = jax.block_until_ready(out_x2)
    ref_y2, ref_x2 = ref_forward(raw2, x2, None, shape=None, out_shape=W)

    assert out_y2.shape == (N, out2, H, W), out_y2.shape
    assert jnp.allclose(out_y2, ref_y2, atol=1e-4, rtol=1e-4), "nofuse conv2 mismatch"
    assert jnp.allclose(out_x2, ref_x2, atol=1e-4, rtol=1e-4), "nofuse feature mismatch"

    print("KERNEL_OK")
</pallas_src>

<mosaic_0001>
module attributes {stable_mosaic.version = 11 : i64} {
  func.func @_stage1_fuse_kernel(%arg0: i32, %arg1: memref<8x64xf32, #tpu.memory_space<vmem>>, %arg2: memref<8x128xf32, #tpu.memory_space<vmem>>, %arg3: memref<64x128xf32, #tpu.memory_space<vmem>>, %arg4: memref<128x32xf32, #tpu.memory_space<vmem>>, %arg5: memref<128x32xf32, #tpu.memory_space<vmem>>, %arg6: memref<1x32xf32, #tpu.memory_space<vmem>>, %arg7: memref<16x128xf32, #tpu.memory_space<vmem>>, %arg8: memref<1x128xf32, #tpu.memory_space<vmem>>, %arg9: memref<1x128xf32, #tpu.memory_space<vmem>>, %arg10: memref<8x128xf32, #tpu.memory_space<vmem>>) attributes {dimension_semantics = [#tpu.dimension_semantics<parallel>], iteration_bounds = array<i64: 1>, scalar_prefetch = 0 : i64, scratch_operands = 0 : i64, tpu.core_type = #tpu.core_type<tc>, window_params = [{transform_indices = @transform_0, window_bounds = array<i64: 8, 64>}, {transform_indices = @transform_1, window_bounds = array<i64: 8, 128>}, {pipeline_mode = #tpu.pipeline_mode<synchronous>, transform_indices = @transform_2, window_bounds = array<i64: 64, 128>}, {pipeline_mode = #tpu.pipeline_mode<synchronous>, transform_indices = @transform_3, window_bounds = array<i64: 128, 32>}, {pipeline_mode = #tpu.pipeline_mode<synchronous>, transform_indices = @transform_4, window_bounds = array<i64: 128, 32>}, {pipeline_mode = #tpu.pipeline_mode<synchronous>, transform_indices = @transform_5, window_bounds = array<i64: 1, 32>}, {pipeline_mode = #tpu.pipeline_mode<synchronous>, transform_indices = @transform_6, window_bounds = array<i64: 16, 128>}, {pipeline_mode = #tpu.pipeline_mode<synchronous>, transform_indices = @transform_7, window_bounds = array<i64: 1, 128>}, {pipeline_mode = #tpu.pipeline_mode<synchronous>, transform_indices = @transform_8, window_bounds = array<i64: 1, 128>}, {transform_indices = @transform_9, window_bounds = array<i64: 8, 128>}]} {
    %c0 = arith.constant 0 : index
    %c0_0 = arith.constant 0 : index
    %0 = vector.load %arg1[%c0, %c0_0] : memref<8x64xf32, #tpu.memory_space<vmem>>, vector<8x64xf32>
    %c0_1 = arith.constant 0 : index
    %c0_2 = arith.constant 0 : index
    %1 = vector.load %arg2[%c0_1, %c0_2] : memref<8x128xf32, #tpu.memory_space<vmem>>, vector<8x128xf32>
    %c0_3 = arith.constant 0 : index
    %c0_4 = arith.constant 0 : index
    %2 = vector.load %arg3[%c0_3, %c0_4] : memref<64x128xf32, #tpu.memory_space<vmem>>, vector<64x128xf32>
    %cst = arith.constant dense<0.000000e+00> : vector<8x128xf32>
    %3 = tpu.matmul %0, %2, %cst {dimension_numbers = #tpu.dot_dimension_numbers<[1], [0], [0], [1], [0, 0, 1, 1], [], []>} : vector<8x64xf32>, vector<64x128xf32>, vector<8x128xf32> -> vector<8x128xf32>
    %c0_5 = arith.constant 0 : index
    %c0_6 = arith.constant 0 : index
    %4 = vector.load %arg8[%c0_5, %c0_6] : memref<1x128xf32, #tpu.memory_space<vmem>>, vector<1x128xf32>
    %5 = vector.broadcast %4 : vector<1x128xf32> to vector<8x128xf32>
    %6 = arith.mulf %3, %5 : vector<8x128xf32>
    %c0_7 = arith.constant 0 : index
    %c0_8 = arith.constant 0 : index
    %7 = vector.load %arg9[%c0_7, %c0_8] : memref<1x128xf32, #tpu.memory_space<vmem>>, vector<1x128xf32>
    %8 = vector.broadcast %7 : vector<1x128xf32> to vector<8x128xf32>
    %9 = arith.addf %6, %8 : vector<8x128xf32>
    %c0_9 = arith.constant 0 : index
    %c0_10 = arith.constant 0 : index
    %10 = vector.load %arg4[%c0_9, %c0_10] : memref<128x32xf32, #tpu.memory_space<vmem>>, vector<128x32xf32>
    %cst_11 = arith.constant dense<0.000000e+00> : vector<8x32xf32>
    %11 = tpu.matmul %9, %10, %cst_11 {dimension_numbers = #tpu.dot_dimension_numbers<[1], [0], [0], [1], [0, 0, 1, 1], [], []>} : vector<8x128xf32>, vector<128x32xf32>, vector<8x32xf32> -> vector<8x32xf32>
    %c0_12 = arith.constant 0 : index
    %c0_13 = arith.constant 0 : index
    %12 = vector.load %arg5[%c0_12, %c0_13] : memref<128x32xf32, #tpu.memory_space<vmem>>, vector<128x32xf32>
    %cst_14 = arith.constant dense<0.000000e+00> : vector<8x32xf32>
    %13 = tpu.matmul %1, %12, %cst_14 {dimension_numbers = #tpu.dot_dimension_numbers<[1], [0], [0], [1], [0, 0, 1, 1], [], []>} : vector<8x128xf32>, vector<128x32xf32>, vector<8x32xf32> -> vector<8x32xf32>
    %14 = arith.addf %11, %13 : vector<8x32xf32>
    %c0_15 = arith.constant 0 : index
    %c0_16 = arith.constant 0 : index
    %15 = vector.load %arg6[%c0_15, %c0_16] : memref<1x32xf32, #tpu.memory_space<vmem>>, vector<1x32xf32>
    %16 = vector.broadcast %15 : vector<1x32xf32> to vector<8x32xf32>
    %17 = arith.addf %14, %16 : vector<8x32xf32>
    %18 = arith.negf %17 : vector<8x32xf32>
    %19 = math.exp %18 : vector<8x32xf32>
    %cst_17 = arith.constant 1.000000e+00 : f32
    %20 = vector.broadcast %cst_17 : f32 to vector<8x32xf32>
    %21 = arith.addf %20, %19 : vector<8x32xf32>
    %22 = arith.divf %20, %21 : vector<8x32xf32>
    %23 = vector.extract_strided_slice %22 {offsets = [0, 0], sizes = [8, 16], strides = [1, 1]} : vector<8x32xf32> to vector<8x16xf32>
    %c0_18 = arith.constant 0 : index
    %c0_19 = arith.constant 0 : index
    %24 = vector.load %arg7[%c0_18, %c0_19] : memref<16x128xf32, #tpu.memory_space<vmem>>, vector<16x128xf32>
    %cst_20 = arith.constant dense<0.000000e+00> : vector<8x128xf32>
    %25 = tpu.matmul %23, %24, %cst_20 {dimension_numbers = #tpu.dot_dimension_numbers<[1], [0], [0], [1], [0, 0, 1, 1], [], []>} : vector<8x16xf32>, vector<16x128xf32>, vector<8x128xf32> -> vector<8x128xf32>
    %26 = vector.extract_strided_slice %22 {offsets = [0, 16], sizes = [8, 16], strides = [1, 1]} : vector<8x32xf32> to vector<8x16xf32>
    %c0_21 = arith.constant 0 : index
    %c0_22 = arith.constant 0 : index
    %27 = vector.load %arg7[%c0_21, %c0_22] : memref<16x128xf32, #tpu.memory_space<vmem>>, vector<16x128xf32>
    %cst_23 = arith.constant dense<0.000000e+00> : vector<8x128xf32>
    %28 = tpu.matmul %26, %27, %cst_23 {dimension_numbers = #tpu.dot_dimension_numbers<[1], [0], [0], [1], [0, 0, 1, 1], [], []>} : vector<8x16xf32>, vector<16x128xf32>, vector<8x128xf32> -> vector<8x128xf32>
    %29 = arith.mulf %9, %25 : vector<8x128xf32>
    %30 = arith.mulf %1, %28 : vector<8x128xf32>
    %31 = arith.addf %29, %30 : vector<8x128xf32>
    %c0_24 = arith.constant 0 : index
    %c0_25 = arith.constant 0 : index
    %32 = vector.load %arg10[%c0_24, %c0_25] : memref<8x128xf32, #tpu.memory_space<vmem>>, vector<8x128xf32>
    tpu.vector_store %arg10[%c0_24, %c0_25], %31 {strides = array<i32>} : memref<8x128xf32, #tpu.memory_space<vmem>>, vector<8x128xf32>,
    return
  }
  func.func @transform_0(%arg0: i32) -> (i32, i32) {
    %c0_i32 = arith.constant 0 : i32
    %c0_i32_0 = arith.constant 0 : i32
    return %arg0, %c0_i32 : i32, i32
  }
  func.func @transform_1(%arg0: i32) -> (i32, i32) {
    %c0_i32 = arith.constant 0 : i32
    %c0_i32_0 = arith.constant 0 : i32
    return %arg0, %c0_i32 : i32, i32
  }
  func.func @transform_2(%arg0: i32) -> (i32, i32) {
    %c0_i32 = arith.constant 0 : i32
    %c0_i32_0 = arith.constant 0 : i32
    %c0_i32_1 = arith.constant 0 : i32
    return %c0_i32, %c0_i32_0 : i32, i32
  }
  func.func @transform_3(%arg0: i32) -> (i32, i32) {
    %c0_i32 = arith.constant 0 : i32
    %c0_i32_0 = arith.constant 0 : i32
    %c0_i32_1 = arith.constant 0 : i32
    return %c0_i32, %c0_i32_0 : i32, i32
  }
  func.func @transform_4(%arg0: i32) -> (i32, i32) {
    %c0_i32 = arith.constant 0 : i32
    %c0_i32_0 = arith.constant 0 : i32
    %c0_i32_1 = arith.constant 0 : i32
    return %c0_i32, %c0_i32_0 : i32, i32
  }
  func.func @transform_5(%arg0: i32) -> (i32, i32) {
    %c0_i32 = arith.constant 0 : i32
    %c0_i32_0 = arith.constant 0 : i32
    %c0_i32_1 = arith.constant 0 : i32
    return %c0_i32, %c0_i32_0 : i32, i32
  }
  func.func @transform_6(%arg0: i32) -> (i32, i32) {
    %c0_i32 = arith.constant 0 : i32
    %c0_i32_0 = arith.constant 0 : i32
    %c0_i32_1 = arith.constant 0 : i32
    return %c0_i32, %c0_i32_0 : i32, i32
  }
  func.func @transform_7(%arg0: i32) -> (i32, i32) {
    %c0_i32 = arith.constant 0 : i32
    %c0_i32_0 = arith.constant 0 : i32
    %c0_i32_1 = arith.constant 0 : i32
    return %c0_i32, %c0_i32_0 : i32, i32
  }
  func.func @transform_8(%arg0: i32) -> (i32, i32) {
    %c0_i32 = arith.constant 0 : i32
    %c0_i32_0 = arith.constant 0 : i32
    %c0_i32_1 = arith.constant 0 : i32
    return %c0_i32, %c0_i32_0 : i32, i32
  }
  func.func @transform_9(%arg0: i32) -> (i32, i32) {
    %c0_i32 = arith.constant 0 : i32
    %c0_i32_0 = arith.constant 0 : i32
    return %arg0, %c0_i32 : i32, i32
  }
}

</mosaic_0001>

<bundles_post_ra>
// kernel: tpu_custom_call.1
= control target key start
LH: loop header
LB: loop body
LE: loop exit
PB: predicated region body
PF: predicated region fallthrough
CT: control target
= control target key end

     0   :  { %v676_v1 = vmov 0.0   ;;  %vm677_vm0 = vmmov 0   ;;  %s928_s0 = inlined_call_operand.vmem [shape: f32[8,64], index: 0, kind: input, shape index: {}]   ;;  %s929_s1 = inlined_call_operand.vmem [shape: f32[8,128], index: 1, kind: input, shape index: {}]   ;;  %s930_s2 = inlined_call_operand.vmem [shape: f32[64,128], index: 2, kind: input, shape index: {}]   ;;  %s931_s3 = inlined_call_operand.vmem [shape: f32[128,32], index: 3, kind: input, shape index: {}]   ;;  %s932_s4 = inlined_call_operand.vmem [shape: f32[128,32], index: 4, kind: input, shape index: {}]   ;;  %s933_s5 = inlined_call_operand.vmem [shape: f32[1,32], index: 5, kind: input, shape index: {}]   ;;  %s934_s6 = inlined_call_operand.vmem [shape: f32[16,128], index: 6, kind: input, shape index: {}]   ;;  %s935_s7 = inlined_call_operand.vmem [shape: f32[1,128], index: 7, kind: input, shape index: {}]   ;;  %s936_s8 = inlined_call_operand.vmem [shape: f32[1,128], index: 8, kind: input, shape index: {}]   ;;  %s937_s9 = inlined_call_operand.hbm [shape: f32[8,128], index: 9, kind: output, shape index: {}]  }
   0x1   :  { %v42_v0 = vld [vmem:[%s930_s2 + $0x38] sm:$0xff]  ;;  %543 = vmatprep.subr.mxu0 %v676_v1  ;;  %v41_v2 = vld [vmem:[%s930_s2 + $0x30] sm:$0xff]  ;;  %559 = vmatprep.mubr.msk.f32.mxu0 %vm677_vm0, %v676_v1  ;;  %v40_v3 = vld [vmem:[%s930_s2 + $0x28] sm:$0xff] }
   0x2   :  { %544 = vmatpush3.msra.mxu0 %v42_v0  ;;  %562 = vmatprep.subr.mxu1 %v676_v1  ;;  %v164_v4 = vld [vmem:[%s932_s4 + $0x78] sm:$0xff]  ;;  %v163_v5 = vld [vmem:[%s932_s4 + $0x70] sm:$0xff]  ;;  %v39_v6 = vld [vmem:[%s930_s2 + $0x20] sm:$0xff] }
   0x3   :  { %545 = vmatprep.subr.mxu0 %v676_v1  ;;  %594 = vmatprep.mubr.msk.f32.mxu1 %vm677_vm0, %v676_v1  ;;  %v162_v7 = vld [vmem:[%s932_s4 + $0x68] sm:$0xff]  ;;  %v38_v8 = vld [vmem:[%s930_s2 + $0x18] sm:$0xff]  ;;  %v161_v9 = vld [vmem:[%s932_s4 + $0x60] sm:$0xff] }
   0x4   :  { %546 = vmatpush3.msra.mxu0 %v41_v2  ;;  %563 = vmatpush3.msra.mxu1 %v164_v4  ;;  %v37_v10 = vld [vmem:[%s930_s2 + $0x10] sm:$0xff]  ;;  %v160_v11 = vld [vmem:[%s932_s4 + $0x58] sm:$0xff]  ;;  %v36_v12 = vld [vmem:[%s930_s2 + $0x8] sm:$0xff] }
   0x5   :  { %547 = vmatprep.subr.mxu0 %v676_v1  ;;  %564 = vmatprep.subr.mxu1 %v676_v1  ;;  %v159_v13 = vld [vmem:[%s932_s4 + $0x50] sm:$0xff] }
   0x6   :  { %548 = vmatpush3.msra.mxu0 %v40_v3  ;;  %565 = vmatpush3.msra.mxu1 %v163_v5 }
   0x7   :  { %549 = vmatprep.subr.mxu0 %v676_v1  ;;  %566 = vmatprep.subr.mxu1 %v676_v1 }
   0x8   :  { %550 = vmatpush3.msra.mxu0 %v39_v6  ;;  %567 = vmatpush3.msra.mxu1 %v162_v7 }
   0x9   :  { %551 = vmatprep.subr.mxu0 %v676_v1  ;;  %568 = vmatprep.subr.mxu1 %v676_v1 }
   0xa   :  { %552 = vmatpush3.msra.mxu0 %v38_v8  ;;  %569 = vmatpush3.msra.mxu1 %v161_v9 }
   0xb   :  { %553 = vmatprep.subr.mxu0 %v676_v1  ;;  %570 = vmatprep.subr.mxu1 %v676_v1 }
   0xc   :  { %554 = vmatpush3.msra.mxu0 %v37_v10  ;;  %571 = vmatpush3.msra.mxu1 %v160_v11 }
   0xd   :  { %14 = vsyncpa [#allocation3], 0  ;;  %555 = vmatprep.subr.mxu0 %v676_v1  ;;  %v35_v14 = vld [vmem:[%s930_s2] sm:$0xff]  ;;  %572 = vmatprep.subr.mxu1 %v676_v1  ;;  %v158_v15 = vld [vmem:[%s932_s4 + $0x48] sm:$0xff]  ;;  %vm43_vm1 = vcmask 523264   ;;  %vm321_vm2 = vcmask 130048  }
   0xe   :  { %556 = vmatpush3.msra.mxu0 %v36_v12  ;;  %v33_v16 = vld [vmem:[%s928_s0] sm:$0xff]  ;;  %573 = vmatpush3.msra.mxu1 %v159_v13  ;;  %v148_v17 = vld [vmem:[%s931_s3 + $0x78] sm:$0xff]  ;;  %v147_v19 = vld [vmem:[%s931_s3 + $0x70] sm:$0xff] }
   0xf   :  { %557 = vmatprep.subr.mxu0 %v676_v1  ;;  %574 = vmatprep.subr.mxu1 %v676_v1  ;;  %v157_v18 = vld [vmem:[%s932_s4 + $0x40] sm:$0xff]  ;;  %v156_v20 = vld [vmem:[%s932_s4 + $0x38] sm:$0xff]  ;;  %v146_v21 = vld [vmem:[%s931_s3 + $0x68] sm:$0xff] }
  0x10   :  { %558 = vmatpush3.msra.mxu0 %v35_v14  ;;  %575 = vmatpush3.msra.mxu1 %v158_v15  ;;  %v155_v22 = vld [vmem:[%s932_s4 + $0x30] sm:$0xff]  ;;  %v145_v23 = vld [vmem:[%s931_s3 + $0x60] sm:$0xff]  ;;  %v154_v24 = vld [vmem:[%s932_s4 + $0x28] sm:$0xff] }
  0x11   :  { %560 = vmatmul.mubr.msk.f32.vlgmr.msra.gmra.mxu0 %vm43_vm1, %v33_v16  ;;  %597 = vmatprep.subr.mxu0 %v676_v1  ;;  %v144_v25 = vld [vmem:[%s931_s3 + $0x58] sm:$0xff]  ;;  %v153_v26 = vld [vmem:[%s932_s4 + $0x20] sm:$0xff]  ;;  %v143_v27 = vld [vmem:[%s931_s3 + $0x50] sm:$0xff] }
  0x12   :  { %598 = vmatpush3.msra.mxu0 %v148_v17  ;;  %576 = vmatprep.subr.mxu1 %v676_v1  ;;  %v152_v28 = vld [vmem:[%s932_s4 + $0x18] sm:$0xff]  ;;  %v142_v29 = vld [vmem:[%s931_s3 + $0x48] sm:$0xff]  ;;  %v151_v30 = vld [vmem:[%s932_s4 + $0x10] sm:$0xff] }
  0x13   :  { %599 = vmatprep.subr.mxu0 %v676_v1  ;;  %577 = vmatpush3.msra.mxu1 %v157_v18  ;;  %v141_v31 = vld [vmem:[%s931_s3 + $0x40] sm:$0xff]  ;;  %v140_v32 = vld [vmem:[%s931_s3 + $0x38] sm:$0xff]  ;;  %v139_v33 = vld [vmem:[%s931_s3 + $0x30] sm:$0xff] }
  0x14   :  { %600 = vmatpush3.msra.mxu0 %v147_v19  ;;  %578 = vmatprep.subr.mxu1 %v676_v1  ;;  %v138_v34 = vld [vmem:[%s931_s3 + $0x28] sm:$0xff]  ;;  %v137_v35 = vld [vmem:[%s931_s3 + $0x20] sm:$0xff]  ;;  %v136_v36 = vld [vmem:[%s931_s3 + $0x18] sm:$0xff] }
  0x15   :  { %601 = vmatprep.subr.mxu0 %v676_v1  ;;  %579 = vmatpush3.msra.mxu1 %v156_v20  ;;  %v150_v37 = vld [vmem:[%s932_s4 + $0x8] sm:$0xff]  ;;  %v135_v38 = vld [vmem:[%s931_s3 + $0x10] sm:$0xff]  ;;  %v149_v39 = vld [vmem:[%s932_s4] sm:$0xff] }
  0x16   :  { %602 = vmatpush3.msra.mxu0 %v146_v21  ;;  %580 = vmatprep.subr.mxu1 %v676_v1  ;;  %v134_v40 = vld [vmem:[%s931_s3 + $0x8] sm:$0xff]  ;;  %v34_v41 = vld [vmem:[%s929_s1] sm:$0xff] }
  0x17   :  { %603 = vmatprep.subr.mxu0 %v676_v1  ;;  %581 = vmatpush3.msra.mxu1 %v155_v22  ;;  %v133_v42 = vld [vmem:[%s931_s3] sm:$0xff]  ;;  %v320_v51 = vld [vmem:[%s934_s6 + $0x8] sm:$0xff] }
  0x18   :  { %604 = vmatpush3.msra.mxu0 %v145_v23  ;;  %582 = vmatprep.subr.mxu1 %v676_v1  ;;  %v488_v43 = vld [vmem:[%s935_s7] ss:$0 sm:$0xff] }
  0x19   :  { %605 = vmatprep.subr.mxu0 %v676_v1  ;;  %583 = vmatpush3.msra.mxu1 %v154_v24  ;;  %v489_v45 = vld [vmem:[%s936_s8] ss:$0 sm:$0xff] }
  0x1a   :  { %606 = vmatpush3.msra.mxu0 %v144_v25  ;;  %584 = vmatprep.subr.mxu1 %v676_v1  ;;  %v319_v52 = vld [vmem:[%s934_s6] sm:$0xff]  ;;  %s678_s6 = smov 112  }
  0x1b   :  { %607 = vmatprep.subr.mxu0 %v676_v1  ;;  %585 = vmatpush3.msra.mxu1 %v153_v26  ;;  %v490_v54 = vld [vmem:[%s933_s5] ss:$0 sm:$0xff]  ;;  %s679_s5 = smov [#allocation2]  }
  0x1c   :  { %608 = vmatpush3.msra.mxu0 %v143_v27  ;;  %586 = vmatprep.subr.mxu1 %v676_v1  ;;  %s479_s29 = sshll.u32 %s679_s5, 4  ;;  %s480_s29 = int_to_ptr.vmem [resolvable:$true] %s479_s29 }
  0x1d   :  { %609 = vmatprep.subr.mxu0 %v676_v1  ;;  %587 = vmatpush3.msra.mxu1 %v152_v28  ;;  %s654_s30 = scalar_lea.vmem %s480_s29, 128  ;;  %p659_p1 = scmp.lt.s32.totalorder %s480_s29, %s480_s29 }
  0x1e   :  { %610 = vmatpush3.msra.mxu0 %v142_v29  ;;  %588 = vmatprep.subr.mxu1 %v676_v1  ;;  %p655_p0 = scmp.ne.s32.totalorder %s480_s29, %s654_s30  ;;  %p660_p2 = scmp.lt.s32.totalorder %s654_s30, %s654_s30 }
  0x1f   :  { %611 = vmatprep.subr.mxu0 %v676_v1  ;;  %589 = vmatpush3.msra.mxu1 %v151_v30 }
  0x20   :  { %612 = vmatpush3.msra.mxu0 %v141_v31  ;;  %590 = vmatprep.subr.mxu1 %v676_v1  ;;  %p661_p3 = por %p660_p2, %p659_p1 }
  0x21   :  { %613 = vmatprep.subr.mxu0 %v676_v1  ;;  %629 = vmatprep.mubr.msk.f32.mxu0 %vm677_vm0, %v676_v1 }
  0x22   :  { %614 = vmatpush3.msra.mxu0 %v140_v32  ;;  %591 = vmatpush3.msra.mxu1 %v150_v37  ;;  %p662_p4 = pnand %p661_p3, %p655_p0 }
  0x23   :  { %615 = vmatprep.subr.mxu0 %v676_v1  ;;  %592 = vmatprep.subr.mxu1 %v676_v1 }
  0x24   :  { %616 = vmatpush3.msra.mxu0 %v139_v33  ;;  %593 = vmatpush3.msra.mxu1 %v149_v39 }
  0x25   :  { %617 = vmatprep.subr.mxu0 %v676_v1  ;;  %595 = vmatmul.mubr.f32.vlgmr.msra.gmra.mxu1 %v34_v41 }
  0x26   :  { %618 = vmatpush3.msra.mxu0 %v138_v34  ;;  %632 = vmatprep.subr.mxu1 %v676_v1 }
  0x27   :  { %619 = vmatprep.subr.mxu0 %v676_v1  ;;  %636 = vmatprep.mubr.msk.f32.mxu1 %vm677_vm0, %v676_v1 }
  0x28   :  { %620 = vmatpush3.msra.mxu0 %v137_v35  ;;  %633 = vmatpush3.msra.mxu1 %v320_v51 }
  0x29   :  { %621 = vmatprep.subr.mxu0 %v676_v1  ;;  %634 = vmatprep.subr.mxu1 %v676_v1 }
  0x2a   :  { %622 = vmatpush3.msra.mxu0 %v136_v36  ;;  %635 = vmatpush3.msra.mxu1 %v319_v52 }
  0x2b   :  { %623 = vmatprep.subr.mxu0 %v676_v1  ;;  %639 = vmatprep.subr.mxu1 %v676_v1 }
  0x2c   :  { %624 = vmatpush3.msra.mxu0 %v135_v38 }
  0x2d   :  { %625 = vmatprep.subr.mxu0 %v676_v1 }
  0x2e   :  { %626 = vmatpush3.msra.mxu0 %v134_v40 }
  0x2f   :  { %627 = vmatprep.subr.mxu0 %v676_v1 }
  0x30   :  { %628 = vmatpush3.msra.mxu0 %v133_v42 }
  0xd1   :  { %v113_v44 = vpop.f32.mrf.mxu0 }
  0xd2   :  { %v124_v46 = vmul.f32 %v488_v43, %v113_v44 }
  0xd3   :  { %v561_v47 = vpop.f32.mrf.mxu0 }
  0xd4   :  { %v132_v48 = vadd.f32 %v489_v45, %v124_v46 }
  0xd6   :  { %630 = vmatmul.mubr.f32.vlgmr.msra.gmra.mxu0 %v132_v48 }
  0xe5   :  { %v231_v49 = vpop.f32.mrf.mxu1 }
  0xe7   :  { %v596_v50 = vpop.f32.mrf.mxu1 }
 0x196   :  { %v301_v53 = vpop.f32.mrf.mxu0 }
 0x197   :  { %v302_v55 = vadd.f32 %v301_v53, %v231_v49 }
 0x198   :  { %v631_v56 = vpop.f32.mrf.mxu0 }
 0x199   :  { %v312_v57 = vadd.f32 %v490_v54, %v302_v55 }
 0x19b   :  { %v491_v58 = vmul.f32 -1.442695, %v312_v57 }
 0x19d   :  { %650 = vpow2.f32 %v491_v58 }
 0x1aa   :  { %v651_v59 = vpop.eup %650 }
 0x1ab   :  { %v316_v60 = vadd.f32 1.0, %v651_v59 }
 0x1ad   :  { %652 = vrcp.f32 %v316_v60 }
 0x1ba   :  { %v653_v61 = vpop.eup %652 }
 0x1bb   :  { %637 = vmatmul.mubr.msk.f32.vlgmr.msra.gmra.mxu1 %vm321_vm2, %v653_v61  ;;  %395 = vrot.lane.b32.xlu0 %v653_v61, %s678_s6 }
 0x1bc   :  { %640 = vmatpush3.msra.mxu1 %v320_v51  ;;  %643 = vmatprep.mubr.msk.f32.mxu1 %vm677_vm0, %v676_v1 }
 0x1bd   :  { %641 = vmatprep.subr.mxu1 %v676_v1 }
 0x1be   :  { %642 = vmatpush3.msra.mxu1 %v319_v52 }
 0x22d   :  { %v396_v62 = vpop.permute.xlu0 %395 }
 0x22e   :  { %644 = vmatmul.mubr.msk.f32.vlgmr.msra.gmra.mxu1 %vm321_vm2, %v396_v62 }
 0x27b   :  { %v391_v63 = vpop.f32.mrf.mxu1 }
 0x27c   :  { %v469_v3 = vmul.f32 %v391_v63, %v132_v48 }
 0x27d   :  { %v638_v0 = vpop.f32.mrf.mxu1 }
 0x2ee   :  { %v465_v2 = vpop.f32.mrf.mxu1 }
 0x2ef   :  { %v470_v4 = vmul.f32 %v465_v2, %v34_v41 }
 0x2f0   :  { %v645_v5 = vpop.f32.mrf.mxu1 }
 0x2f1   :  { %v471_v6 = vadd.f32 %v470_v4, %v469_v3 }
 0x2f3   :  { %472 = vst [vmem:[#allocation2] sm:$0xff] %v471_v6 }
 0x2f4   :  { %665 = shalt.err (!%p662_p4)
}
 0x2f5   :  { %482 = dma.vmem_to_hbm [thread:$0]  %s480_s29, 128, %s937_s9, [#allocation3]  }
 0x2f6   :  { %674 = dma.done.wait [#allocation3], 128  }
 0x2f7   :  { %675 = vsyncadd [#allocation3], 4294967168 }
 0x2f8   :  { %486 = vsyncpa [#allocation3], 1 }

</bundles_post_ra>
